<compile_context>
chip_gen: v7x
topology: tpu7x:2x2x1
jax: 0.10.0
libtpu: 0.0.40
codegen_flags: <defaults>
</compile_context>

<pallas_src>
import jax
import jax.numpy as jnp
from jax.experimental import pallas as pl
from jax.experimental.pallas import tpu as pltpu

N = 50          # hard-coded by BCERankingLoss.forward (d0.view(50, 1, 1, 1))
N_PAD = 128     # batch padded onto the 128-lane axis inside the kernel
C_IN = 5        # five concatenated distance features
CHN_MID = 32
EPS = 0.1
SLOPE = 0.2     # LeakyReLU negative slope

# Packed weight slab (88, 128) bf16, all slices 16-sublane aligned:
#   rows  0:32, lanes 0:8  -> W1eff^T (d0-d1 folded into d0/d1 cols) | b1 col (lane 4)
#   rows 32:64, lanes 0:40 -> W2^T (32x32) | b2 col (lane 32)
#   rows 64:72, lanes 0:40 -> row 64 = [W3^T (32) | b3 (lane 32)], rows 65..71 = 0
#   rows 80:88             -> bias tail: row 80 = ones, rows 81..87 = 0
W_ROWS = 88


def _bce_ranking_kernel(d0_ref, d1_ref, judge_ref, w_ref, out_ref, feats_ref):
    # Zero the feature scratch first: defines the padded lanes and the unused rows so
    # zero-weight columns cannot pull undefined garbage (NaN/Inf) into the contraction.
    feats_ref[...] = jnp.zeros((8, N_PAD), jnp.float32)

    d0 = d0_ref[...]          # (1, N) f32
    d1 = d1_ref[...]          # (1, N) f32

    # Nonlinear ratio features via EUP approx reciprocals.  The linear (d0 - d1)
    # feature is folded into the packed W1, so it is not computed at runtime.
    r0 = d0 * pl.reciprocal(d1 + EPS, approx=True)
    r1 = d1 * pl.reciprocal(d0 + EPS, approx=True)

    # Row-store assembly of the (8, 128) feature tile (no sublane concatenates).
    feats_ref[0:1, 0:N] = d0
    feats_ref[1:2, 0:N] = d1
    feats_ref[2:3, 0:N] = r0
    feats_ref[3:4, 0:N] = r1
    feats_ref[4:5, :] = jnp.ones((1, N_PAD), jnp.float32)   # bias-as-weight row (b1)
    feats_ref[5:6, 0:N] = judge_ref[...]                    # zero-weight col; widens judge to 128 lanes

    feats = feats_ref[...]                                   # (8, N_PAD) f32

    # Packed bf16 weights (built once at init time).
    w1tb = w_ref[0:32, 0:8]       # (32, 8)   W1eff^T | b1 column
    w2tb = w_ref[32:64, 0:40]     # (32, 40)  W2^T | b2 column
    w3tb = w_ref[64:72, 0:40]     # (8, 40)   row 0 = W3^T | b3 column
    tail = w_ref[80:88, :]        # (8, 128)  constant [ones; zeros] bias tail (reused twice)

    # conv1x1 (5->32) + LeakyReLU(0.2).  bf16 MXU operands, f32 accumulation.
    z1 = jnp.dot(w1tb, feats.astype(jnp.bfloat16),
                 preferred_element_type=jnp.float32)         # (32, N_PAD) f32
    h1 = jnp.maximum(z1, SLOPE * z1)

    # conv1x1 (32->32) + LeakyReLU(0.2), bias folded via the shared tail row.
    h1a = jnp.concatenate([h1.astype(jnp.bfloat16), tail], axis=0)   # (40, N_PAD) bf16
    z2 = jnp.dot(w2tb, h1a, preferred_element_type=jnp.float32)      # (32, N_PAD) f32
    h2 = jnp.maximum(z2, SLOPE * z2)

    # conv1x1 (32->1) -> logits; sigmoid handled implicitly by the logit-form BCE.
    h2a = jnp.concatenate([h2.astype(jnp.bfloat16), tail], axis=0)   # (40, N_PAD) bf16
    z3 = jnp.dot(w3tb, h2a, preferred_element_type=jnp.float32)[0:1, :]  # (1, N_PAD)

    # BCE(sigmoid(z), per) in collapsed logits form:
    #   bce = max(z, 0) - per * z + log(1 + exp(-|z|))
    # (torch's -100 log clamp only binds for |z| > ~100, unreachable for this head.)
    judge128 = feats[5:6, :]                       # padded lanes are 0
    per = (judge128 + 1.0) * 0.5
    bce = jnp.maximum(z3, 0.0) - per * z3 + jnp.log(1.0 + jnp.exp(-jnp.abs(z3)))

    # Mask padded lanes and take the mean over the 50 real samples.
    lane = jax.lax.broadcasted_iota(jnp.int32, (1, N_PAD), 1)
    loss = jnp.sum(jnp.where(lane < N, bce, 0.0), axis=1, keepdims=True) * (1.0 / N)

    out_ref[...] = loss                            # (1, 1) scalar output, no broadcast


def init_params(key, chn_mid=CHN_MID):
    """Deterministic PyTorch-Conv2d-style uniform init (bound = 1/sqrt(fan_in))."""
    k1, k2, k3, k4, k5, k6 = jax.random.split(key, 6)

    def unif(k, shape, fan_in):
        bound = 1.0 / float(fan_in) ** 0.5
        return jax.random.uniform(k, shape, jnp.float32, -bound, bound)

    w1 = unif(k1, (C_IN, chn_mid), C_IN)
    b1 = unif(k2, (1, chn_mid), C_IN)
    w2 = unif(k3, (chn_mid, chn_mid), chn_mid)
    b2 = unif(k4, (1, chn_mid), chn_mid)
    w3 = unif(k5, (chn_mid, 1), chn_mid)
    b3 = unif(k6, (1, 1), chn_mid)
    return w1, b1, w2, b2, w3, b3


def pack_params(params):
    """Fold weights, biases, the (d0-d1) feature, and the constant bias tail into one
    (88, 128) bf16 slab.  Done once at init, never per call."""
    w1, b1, w2, b2, w3, b3 = params
    slab = jnp.zeros((W_ROWS, N_PAD), jnp.float32)

    w1t = w1.T.astype(jnp.float32)   # (32, 5): cols = [d0, d1, d0-d1, d0/(d1+e), d1/(d0+e)]
    # Fold the linear (d0 - d1) feature into the d0 / d1 coefficient columns.
    slab = slab.at[0:32, 0].set(w1t[:, 0] + w1t[:, 2])
    slab = slab.at[0:32, 1].set(w1t[:, 1] - w1t[:, 2])
    slab = slab.at[0:32, 2].set(w1t[:, 3])
    slab = slab.at[0:32, 3].set(w1t[:, 4])
    slab = slab.at[0:32, 4].set(b1.reshape(-1).astype(jnp.float32))

    slab = slab.at[32:64, 0:32].set(w2.T.astype(jnp.float32))
    slab = slab.at[32:64, 32].set(b2.reshape(-1).astype(jnp.float32))

    slab = slab.at[64, 0:32].set(w3.reshape(-1).astype(jnp.float32))
    slab = slab.at[64, 32].set(b3.reshape(()).astype(jnp.float32))

    slab = slab.at[80, :].set(1.0)   # bias tail row of ones (rows 81..87 stay zero)
    return slab.astype(jnp.bfloat16)


@jax.jit
def bce_ranking_loss(d0, d1, judge, w_slab):
    # Mirror d0.view(50,1,1,1): each sample is a scalar.  Reshapes are metadata-only;
    # there is no stack/pad pre-fusion kernel and no extra HBM round trip.
    d0 = jnp.reshape(d0, (1, N)).astype(jnp.float32)
    d1 = jnp.reshape(d1, (1, N)).astype(jnp.float32)
    judge = jnp.reshape(judge, (1, N)).astype(jnp.float32)

    vmem = pl.BlockSpec(memory_space=pltpu.MemorySpace.VMEM)
    out = pl.pallas_call(
        _bce_ranking_kernel,
        out_shape=jax.ShapeDtypeStruct((1, 1), jnp.float32),
        in_specs=[vmem, vmem, vmem, vmem],   # three tiny data DMAs + one weight-slab DMA
        out_specs=vmem,                       # (1,1) scalar result
        scratch_shapes=[pltpu.VMEM((8, N_PAD), jnp.float32)],   # feature-assembly tile
    )(d0, d1, judge, w_slab)
    return out[0, 0]


if __name__ == "__main__":
    key = jax.random.PRNGKey(0)
    kp, kd0, kd1, kj = jax.random.split(key, 4)

    params = init_params(kp)
    w_slab = pack_params(params)    # packed once at init time, reused per call

    # distances are non-negative; judge in [-1, 1] (so per = (judge+1)/2 in [0, 1])
    d0 = jax.random.uniform(kd0, (N,), jnp.float32, 0.0, 1.0)
    d1 = jax.random.uniform(kd1, (N,), jnp.float32, 0.0, 1.0)
    judge = jax.random.uniform(kj, (N,), jnp.float32, -1.0, 1.0)

    loss = bce_ranking_loss(d0, d1, judge, w_slab)
    jax.block_until_ready(loss)
    print("KERNEL_OK")
</pallas_src>

<mosaic_0001>
module attributes {stable_mosaic.version = 11 : i64} {
  func.func @_bce_ranking_kernel(%arg0: memref<1x50xf32, #tpu.memory_space<vmem>>, %arg1: memref<1x50xf32, #tpu.memory_space<vmem>>, %arg2: memref<1x50xf32, #tpu.memory_space<vmem>>, %arg3: memref<88x128xbf16, #tpu.memory_space<vmem>>, %arg4: memref<1x1xf32, #tpu.memory_space<vmem>>, %arg5: memref<8x128xf32, #tpu.memory_space<vmem>>) attributes {dimension_semantics = [], scalar_prefetch = 0 : i64, scratch_operands = 1 : i64, tpu.core_type = #tpu.core_type<tc>} {
    %cst = arith.constant 0.000000e+00 : f32
    %0 = vector.broadcast %cst : f32 to vector<8x128xf32>
    %c0 = arith.constant 0 : index
    %c0_0 = arith.constant 0 : index
    %1 = vector.load %arg5[%c0, %c0_0] : memref<8x128xf32, #tpu.memory_space<vmem>>, vector<8x128xf32>
    tpu.vector_store %arg5[%c0, %c0_0], %0 {strides = array<i32>} : memref<8x128xf32, #tpu.memory_space<vmem>>, vector<8x128xf32>,
    %c0_1 = arith.constant 0 : index
    %c0_2 = arith.constant 0 : index
    %2 = vector.load %arg0[%c0_1, %c0_2] : memref<1x50xf32, #tpu.memory_space<vmem>>, vector<1x50xf32>
    %c0_3 = arith.constant 0 : index
    %c0_4 = arith.constant 0 : index
    %3 = vector.load %arg1[%c0_3, %c0_4] : memref<1x50xf32, #tpu.memory_space<vmem>>, vector<1x50xf32>
    %cst_5 = arith.constant 1.000000e-01 : f32
    %4 = vector.broadcast %cst_5 : f32 to vector<1x50xf32>
    %5 = arith.addf %3, %4 : vector<1x50xf32>
    %6 = tpu.reciprocal %5 {approx = true} : vector<1x50xf32> -> vector<1x50xf32>
    %7 = arith.mulf %2, %6 : vector<1x50xf32>
    %cst_6 = arith.constant 1.000000e-01 : f32
    %8 = vector.broadcast %cst_6 : f32 to vector<1x50xf32>
    %9 = arith.addf %2, %8 : vector<1x50xf32>
    %10 = tpu.reciprocal %9 {approx = true} : vector<1x50xf32> -> vector<1x50xf32>
    %11 = arith.mulf %3, %10 : vector<1x50xf32>
    %c0_7 = arith.constant 0 : index
    %c0_8 = arith.constant 0 : index
    %12 = vector.load %arg5[%c0_7, %c0_8] : memref<8x128xf32, #tpu.memory_space<vmem>>, vector<1x50xf32>
    tpu.vector_store %arg5[%c0_7, %c0_8], %2 {strides = array<i32>} : memref<8x128xf32, #tpu.memory_space<vmem>>, vector<1x50xf32>,
    %c1 = arith.constant 1 : index
    %c0_9 = arith.constant 0 : index
    %13 = vector.load %arg5[%c1, %c0_9] : memref<8x128xf32, #tpu.memory_space<vmem>>, vector<1x50xf32>
    tpu.vector_store %arg5[%c1, %c0_9], %3 {strides = array<i32>} : memref<8x128xf32, #tpu.memory_space<vmem>>, vector<1x50xf32>,
    %c2 = arith.constant 2 : index
    %c0_10 = arith.constant 0 : index
    %14 = vector.load %arg5[%c2, %c0_10] : memref<8x128xf32, #tpu.memory_space<vmem>>, vector<1x50xf32>
    tpu.vector_store %arg5[%c2, %c0_10], %7 {strides = array<i32>} : memref<8x128xf32, #tpu.memory_space<vmem>>, vector<1x50xf32>,
    %c3 = arith.constant 3 : index
    %c0_11 = arith.constant 0 : index
    %15 = vector.load %arg5[%c3, %c0_11] : memref<8x128xf32, #tpu.memory_space<vmem>>, vector<1x50xf32>
    tpu.vector_store %arg5[%c3, %c0_11], %11 {strides = array<i32>} : memref<8x128xf32, #tpu.memory_space<vmem>>, vector<1x50xf32>,
    %cst_12 = arith.constant 1.000000e+00 : f32
    %16 = vector.broadcast %cst_12 : f32 to vector<1x128xf32>
    %c4 = arith.constant 4 : index
    %c0_13 = arith.constant 0 : index
    %17 = vector.load %arg5[%c4, %c0_13] : memref<8x128xf32, #tpu.memory_space<vmem>>, vector<1x128xf32>
    tpu.vector_store %arg5[%c4, %c0_13], %16 {strides = array<i32>} : memref<8x128xf32, #tpu.memory_space<vmem>>, vector<1x128xf32>,
    %c0_14 = arith.constant 0 : index
    %c0_15 = arith.constant 0 : index
    %18 = vector.load %arg2[%c0_14, %c0_15] : memref<1x50xf32, #tpu.memory_space<vmem>>, vector<1x50xf32>
    %c5 = arith.constant 5 : index
    %c0_16 = arith.constant 0 : index
    %19 = vector.load %arg5[%c5, %c0_16] : memref<8x128xf32, #tpu.memory_space<vmem>>, vector<1x50xf32>
    tpu.vector_store %arg5[%c5, %c0_16], %18 {strides = array<i32>} : memref<8x128xf32, #tpu.memory_space<vmem>>, vector<1x50xf32>,
    %c0_17 = arith.constant 0 : index
    %c0_18 = arith.constant 0 : index
    %20 = vector.load %arg5[%c0_17, %c0_18] : memref<8x128xf32, #tpu.memory_space<vmem>>, vector<8x128xf32>
    %c0_19 = arith.constant 0 : index
    %c0_20 = arith.constant 0 : index
    %21 = vector.load %arg3[%c0_19, %c0_20] : memref<88x128xbf16, #tpu.memory_space<vmem>>, vector<32x8xbf16>
    %c32 = arith.constant 32 : index
    %c0_21 = arith.constant 0 : index
    %22 = vector.load %arg3[%c32, %c0_21] : memref<88x128xbf16, #tpu.memory_space<vmem>>, vector<32x40xbf16>
    %c64 = arith.constant 64 : index
    %c0_22 = arith.constant 0 : index
    %23 = vector.load %arg3[%c64, %c0_22] : memref<88x128xbf16, #tpu.memory_space<vmem>>, vector<8x40xbf16>
    %c80 = arith.constant 80 : index
    %c0_23 = arith.constant 0 : index
    %24 = vector.load %arg3[%c80, %c0_23] : memref<88x128xbf16, #tpu.memory_space<vmem>>, vector<8x128xbf16>
    %25 = arith.truncf %20 : vector<8x128xf32> to vector<8x128xbf16>
    %cst_24 = arith.constant dense<0.000000e+00> : vector<32x128xf32>
    %26 = tpu.matmul %21, %25, %cst_24 {dimension_numbers = #tpu.dot_dimension_numbers<[1], [0], [0], [1], [0, 0, 1, 1], [], []>} : vector<32x8xbf16>, vector<8x128xbf16>, vector<32x128xf32> -> vector<32x128xf32>
    %cst_25 = arith.constant 2.000000e-01 : f32
    %27 = vector.broadcast %cst_25 : f32 to vector<32x128xf32>
    %28 = arith.mulf %27, %26 : vector<32x128xf32>
    %29 = arith.maximumf %26, %28 : vector<32x128xf32>
    %30 = arith.truncf %29 : vector<32x128xf32> to vector<32x128xbf16>
    %31 = tpu.concatenate %30, %24 in 0 : vector<32x128xbf16>, vector<8x128xbf16> -> vector<40x128xbf16>
    %cst_26 = arith.constant dense<0.000000e+00> : vector<32x128xf32>
    %32 = tpu.matmul %22, %31, %cst_26 {dimension_numbers = #tpu.dot_dimension_numbers<[1], [0], [0], [1], [0, 0, 1, 1], [], []>} : vector<32x40xbf16>, vector<40x128xbf16>, vector<32x128xf32> -> vector<32x128xf32>
    %cst_27 = arith.constant 2.000000e-01 : f32
    %33 = vector.broadcast %cst_27 : f32 to vector<32x128xf32>
    %34 = arith.mulf %33, %32 : vector<32x128xf32>
    %35 = arith.maximumf %32, %34 : vector<32x128xf32>
    %36 = arith.truncf %35 : vector<32x128xf32> to vector<32x128xbf16>
    %37 = tpu.concatenate %36, %24 in 0 : vector<32x128xbf16>, vector<8x128xbf16> -> vector<40x128xbf16>
    %cst_28 = arith.constant dense<0.000000e+00> : vector<8x128xf32>
    %38 = tpu.matmul %23, %37, %cst_28 {dimension_numbers = #tpu.dot_dimension_numbers<[1], [0], [0], [1], [0, 0, 1, 1], [], []>} : vector<8x40xbf16>, vector<40x128xbf16>, vector<8x128xf32> -> vector<8x128xf32>
    %39 = vector.extract_strided_slice %38 {offsets = [0, 0], sizes = [1, 128], strides = [1, 1]} : vector<8x128xf32> to vector<1x128xf32>
    %40 = vector.extract_strided_slice %20 {offsets = [5, 0], sizes = [1, 128], strides = [1, 1]} : vector<8x128xf32> to vector<1x128xf32>
    %cst_29 = arith.constant 1.000000e+00 : f32
    %41 = vector.broadcast %cst_29 : f32 to vector<1x128xf32>
    %42 = arith.addf %40, %41 : vector<1x128xf32>
    %cst_30 = arith.constant 5.000000e-01 : f32
    %43 = vector.broadcast %cst_30 : f32 to vector<1x128xf32>
    %44 = arith.mulf %42, %43 : vector<1x128xf32>
    %cst_31 = arith.constant 0.000000e+00 : f32
    %45 = vector.broadcast %cst_31 : f32 to vector<1x128xf32>
    %46 = arith.maximumf %39, %45 : vector<1x128xf32>
    %47 = arith.mulf %44, %39 : vector<1x128xf32>
    %48 = arith.subf %46, %47 : vector<1x128xf32>
    %49 = math.absf %39 : vector<1x128xf32>
    %cst_32 = arith.constant 0.000000e+00 : f32
    %50 = vector.broadcast %cst_32 : f32 to vector<1x128xf32>
    %51 = arith.subf %50, %49 : vector<1x128xf32>
    %52 = math.exp %51 : vector<1x128xf32>
    %cst_33 = arith.constant 1.000000e+00 : f32
    %53 = vector.broadcast %cst_33 : f32 to vector<1x128xf32>
    %54 = arith.addf %53, %52 : vector<1x128xf32>
    %55 = math.log %54 : vector<1x128xf32>
    %56 = arith.addf %48, %55 : vector<1x128xf32>
    %57 = tpu.iota {dimensions = array<i32: 1>} : vector<1x128xi32>
    %c50_i32 = arith.constant 50 : i32
    %58 = vector.broadcast %c50_i32 : i32 to vector<1x128xi32>
    %59 = arith.cmpi slt, %57, %58 : vector<1x128xi32>
    %cst_34 = arith.constant 0.000000e+00 : f32
    %60 = vector.broadcast %cst_34 : f32 to vector<1x128xf32>
    %61 = arith.select %59, %56, %60 : vector<1x128xi1>, vector<1x128xf32>
    %cst_35 = arith.constant dense<0.000000e+00> : vector<1xf32>
    %62 = vector.multi_reduction <add>, %61, %cst_35 [1] : vector<1x128xf32> to vector<1xf32>
    %63 = vector.shape_cast %62 : vector<1xf32> to vector<1x1xf32>
    %cst_36 = arith.constant 2.000000e-02 : f32
    %64 = vector.broadcast %cst_36 : f32 to vector<1x1xf32>
    %65 = arith.mulf %63, %64 : vector<1x1xf32>
    %c0_37 = arith.constant 0 : index
    %c0_38 = arith.constant 0 : index
    %66 = vector.load %arg4[%c0_37, %c0_38] : memref<1x1xf32, #tpu.memory_space<vmem>>, vector<1x1xf32>
    tpu.vector_store %arg4[%c0_37, %c0_38], %65 {strides = array<i32>} : memref<1x1xf32, #tpu.memory_space<vmem>>, vector<1x1xf32>,
    return
  }
}

</mosaic_0001>

<bundles_post_ra>
// kernel: bce_ranking_loss.1
= control target key start
LH: loop header
LB: loop body
LE: loop exit
PB: predicated region body
PF: predicated region fallthrough
CT: control target
= control target key end

     0   :  { %9 = vsyncpa [#allocation4], 0  ;;  %s509_s0 = inlined_call_operand.vmem [shape: f32[1,50], index: 0, kind: input, shape index: {}]   ;;  %s510_s1 = inlined_call_operand.vmem [shape: f32[1,50], index: 1, kind: input, shape index: {}]   ;;  %s511_s2 = inlined_call_operand.vmem [shape: f32[1,50], index: 2, kind: input, shape index: {}]   ;;  %s512_s3 = inlined_call_operand.hbm [shape: bf16[88,128], index: 3, kind: input, shape index: {}]   ;;  %s513_s4 = inlined_call_operand.hbm [shape: f32[1,1], index: 4, kind: output, shape index: {}]  }
   0x1   :  { %10 = vsyncpa [#allocation5], 0  ;;  %s425_s15 = smov [#allocation3]   ;;  %s377_s19 = scalar_lea.hbm %s512_s3, 704 }
   0x2   :  { %s22_s16 = sshll.u32 %s425_s15, 4  ;;  %p378_p0 = scmp.ne.s32.totalorder %s512_s3, %s377_s19  ;;  %s23_s16 = int_to_ptr.vmem [resolvable:$true] %s22_s16 }
   0x3   :  { %p381_p1 = scmp.lt.u32.totalorder %s377_s19, %s512_s3 }
   0x5   :  { %p383_p2 = pnand %p381_p1, %p378_p0 }
   0x7   :  { %386 = shalt.err (!%p383_p2)
}
   0x8   :  { %s387_s24 = scalar_lea.vmem %s23_s16, 704  ;;  %p392_p4 = scmp.lt.s32.totalorder %s23_s16, %s23_s16 }
   0x9   :  { %p388_p3 = scmp.ne.s32.totalorder %s23_s16, %s387_s24  ;;  %p393_p5 = scmp.lt.s32.totalorder %s387_s24, %s387_s24 }
   0xb   :  { %p394_p6 = por %p393_p5, %p392_p4 }
   0xd   :  { %p395_p7 = pnand %p394_p6, %p388_p3 }
   0xf   :  { %398 = shalt.err (!%p395_p7)
}
  0x10   :  { %s426_s25 = smov 64   ;;  %s427_s26 = smov 4  }
  0x11   :  { %28 = dma.hbm_to_vmem [thread:$0]  %s512_s3, 704, %s23_s16, [#allocation4], %s426_s25, %s426_s25, %s427_s26  }
  0x12   :  { %421 = dma.done.wait [#allocation4], 704  }
  0x13   :  { %422 = vsyncadd [#allocation4], 4294966592  ;;  %v428_v0 = vmov 0.0   ;;  %v429_v1 = vmov 1.0   ;;  %vm42_vm0 = vcmask 401408   ;;  %vm72_vm1 = vcmask 64512  }
  0x14   :  { %33 = vst [vmem:[#allocation2] sm:$0xff] %v428_v0  ;;  %v34_v2 = vld [vmem:[%s509_s0] sm:$0x1]  ;;  %v365_v7 = vld [vmem:[#allocation3] sm:$0xff]   ;;  %vm79_vm2 = vcmask 1043456   ;;  %v366_v15 = vld [vmem:[#allocation3 + $0x8] sm:$0xff]  }
  0x15   :  { %47 = vst [vmem:[#allocation2 + $0x4] sm:$0x1] %v429_v1  ;;  %v35_v3 = vld [vmem:[%s510_s1] sm:$0x1]  ;;  %v39_v6 = vadd.f32 0.1, %v34_v2  ;;  %332 = vmatprep.mubr.msk.bf16.mxu0 %vm72_vm1, %v365_v7  ;;  %v283_v1 = vlaneseq }
  0x16   :  { %v48_v4 = vld [vmem:[%s511_s2] sm:$0x1]  ;;  %v36_v5 = vadd.f32 0.1, %v35_v3  ;;  %43 = vst.msk [vmem:[#allocation2] sm:$0x1] %vm42_vm0, %v34_v2 }
  0x17   :  { %44 = vst.msk [vmem:[#allocation2 + $0x1] sm:$0x1] %vm42_vm0, %v35_v3  ;;  %49 = vst.msk [vmem:[#allocation2 + $0x5] sm:$0x1] %vm42_vm0, %v48_v4  ;;  %v367_v16 = vld [vmem:[#allocation3 + $0x10] sm:$0xff]   ;;  %vm152_vm3 = vcmask 326656  }
  0x18   :  { %369 = vrcp.f32 %v36_v5  ;;  %342 = vmatprep.mubr.msk.bf16.mxu1 %vm152_vm3, %v367_v16  ;;  %v60_v31 = vld [vmem:[#allocation3 + $0x28] sm:$0xf]  ;;  %v368_v33 = vld [vmem:[#allocation3 + $0x18] sm:$0xff]   ;;  %vm430_vm4 = vmmov 0   ;;  %v59_v48 = vld [vmem:[#allocation3 + $0x20] sm:$0xf] }
  0x19   :  { %371 = vrcp.f32 %v39_v6  ;;  %v160_v32 = vsel %vm79_vm2, %v60_v31, 0  ;;  %vm287_vm6 = vcmask 1040384   ;;  %s431_s0 = smov [#allocation6]   ;;  %vm292_vm7 = vcmask 0  }
  0x1a   :  { %s300_s1 = sshll.u32 %s431_s0, 4  ;;  %s301_s1 = int_to_ptr.vmem [resolvable:$true] %s300_s1 }
  0x1b   :  { %s399_s2 = scalar_lea.vmem %s301_s1, 16  ;;  %s403_s3 = scalar_lea.vmem %s301_s1, 32 }
  0x1c   :  { %p400_p8 = scmp.ne.s32.totalorder %s301_s1, %s399_s2  ;;  %p404_p9 = scmp.lt.s32.totalorder %s301_s1, %s301_s1 }
  0x1d   :  { %p405_p10 = scmp.lt.s32.totalorder %s403_s3, %s399_s2 }
  0x1f   :  { %p406_p11 = por %p405_p10, %p404_p9 }
  0x21   :  { %p407_p12 = pnand %p406_p11, %p400_p8 }
  0x22   :  { %v370_v8 = vpop.eup %369 }
  0x23   :  { %v372_v9 = vpop.eup %371  ;;  %v38_v10 = vmul.f32 %v370_v8, %v34_v2  ;;  %v284_v2 = vand.u32 127, %v283_v1 }
  0x24   :  { %v41_v11 = vmul.f32 %v372_v9, %v35_v3 }
  0x25   :  { %45 = vst.msk [vmem:[#allocation2 + $0x2] sm:$0x1] %vm42_vm0, %v38_v10  ;;  %vm285_vm5 = vcmp.lt.s32.totalorder %v284_v2, 50 }
  0x26   :  { %46 = vst.msk [vmem:[#allocation2 + $0x3] sm:$0x1] %vm42_vm0, %v41_v11 }
  0x2d   :  { %v50_v12 = vld [vmem:[#allocation2] sm:$0xff] }
  0x2e   :  { %v61_v13 = vpack.c.bf16 %v50_v12, %v50_v12  ;;  %v264_v49 = vadd.f32 1.0, %v50_v12 }
  0x30   :  { %356 = vmatprep.subr.msk.bf16.mxu0 %vm79_vm2, %v61_v13  ;;  %v81_v14 = vsel %vm79_vm2, %v61_v13, 0  ;;  %v265_v50 = vmul.f32 0.5, %v264_v49 }
  0x31   :  { %331 = vmatpush3.bf16.msra.mxu0 %v81_v14 }
  0x32   :  { %346 = vmatprep.subr.bf16.mxu0 %v428_v0 }
  0x34   :  { %333 = vmatmul.mubr.msk.bf16.vlgmr.msra.gmra.mrb[0].mxu0 %vm72_vm1, %v366_v15 }
  0x35   :  { %352 = vmatprep.mubr.msk.bf16.mxu0 %vm430_vm4, %v428_v0 }
 0x107   :  { %v334_v17 = vpop.f32.mrb[0].mxu0 }
 0x108   :  { %v134_v18 = vmul.f32 0.2, %v334_v17  ;;  %v117_v19 = vpop.f32.mrb[1].mxu0 }
 0x109   :  { %v132_v20 = vmul.f32 0.2, %v117_v19  ;;  %v335_v21 = vpop.f32.mrb[2].mxu0 }
 0x10a   :  { %v135_v22 = vmul.f32 0.2, %v335_v21  ;;  %v120_v23 = vpop.f32.mrb[3].mxu0  ;;  %v138_v25 = vmax.f32 %v334_v17, %v134_v18 }
 0x10b   :  { %v133_v24 = vmul.f32 0.2, %v120_v23  ;;  %v136_v27 = vmax.f32 %v117_v19, %v132_v20 }
 0x10c   :  { %v139_v26 = vmax.f32 %v335_v21, %v135_v22 }
 0x10d   :  { %v137_v28 = vmax.f32 %v120_v23, %v133_v24 }
 0x10e   :  { %v141_v29 = vpack.c.bf16 %v139_v26, %v138_v25 }
 0x10f   :  { %v140_v30 = vpack.c.bf16 %v137_v28, %v136_v27 }
 0x111   :  { %336 = vmatprep.subr.bf16.mxu1 %v140_v30 }
 0x112   :  { %337 = vmatpush3.bf16.msra.mxu1 %v140_v30 }
 0x113   :  { %338 = vmatprep.subr.bf16.mxu1 %v141_v29 }
 0x116   :  { %339 = vmatpush3.bf16.msra.mxu1 %v141_v29 }
 0x117   :  { %357 = vmatprep.subr.msk.bf16.mxu1 %vm79_vm2, %v60_v31 }
 0x11a   :  { %341 = vmatpush3.bf16.msra.mxu1 %v160_v32 }
 0x11d   :  { %343 = vmatmul.mubr.msk.bf16.vlgmr.msra.gmra.mrb[0].mxu1 %vm152_vm3, %v368_v33 }
 0x1f0   :  { %v344_v34 = vpop.f32.mrb[0].mxu1 }
 0x1f1   :  { %v213_v35 = vmul.f32 0.2, %v344_v34  ;;  %v196_v36 = vpop.f32.mrb[1].mxu1 }
 0x1f2   :  { %v211_v37 = vmul.f32 0.2, %v196_v36  ;;  %v345_v38 = vpop.f32.mrb[2].mxu1 }
 0x1f3   :  { %v214_v39 = vmul.f32 0.2, %v345_v38  ;;  %v199_v40 = vpop.f32.mrb[3].mxu1  ;;  %v217_v42 = vmax.f32 %v344_v34, %v213_v35 }
 0x1f4   :  { %v212_v41 = vmul.f32 0.2, %v199_v40  ;;  %v215_v44 = vmax.f32 %v196_v36, %v211_v37 }
 0x1f5   :  { %v218_v43 = vmax.f32 %v345_v38, %v214_v39 }
 0x1f6   :  { %v216_v45 = vmax.f32 %v199_v40, %v212_v41 }
 0x1f7   :  { %v220_v46 = vpack.c.bf16 %v218_v43, %v217_v42 }
 0x1f8   :  { %v219_v47 = vpack.c.bf16 %v216_v45, %v215_v44 }
 0x1fa   :  { %347 = vmatpush3.bf16.msra.mxu0 %v219_v47 }
 0x1fb   :  { %348 = vmatprep.subr.bf16.mxu0 %v428_v0 }
 0x1fe   :  { %349 = vmatpush3.bf16.msra.mxu0 %v220_v46 }
 0x1ff   :  { %350 = vmatprep.subr.bf16.mxu0 %v428_v0 }
 0x202   :  { %351 = vmatpush3.bf16.msra.mxu0 %v160_v32 }
 0x205   :  { %353 = vmatmul.mubr.msk.bf16.vlgmr.msra.gmra.mrb[4].mxu0 %vm152_vm3, %v59_v48 }
 0x2d8   :  { %v258_v51 = vpop.f32.mrb[4].mxu0 }
 0x2d9   :  { %v268_v52 = vrot.slane %v258_v51, 3  ;;  %v275_v53 = vand.u32 2147483647, %v258_v51  ;;  %v354_v54 = vpop.f32.mrb[5].mxu0  ;;  %v266_v59 = vmax.f32 %v258_v51, 0.0 }
 0x2da   :  { %v261_v55 = vpop.f32.mrb[6].mxu0 }
 0x2db   :  { %v270_v56 = vmul.f32 %v268_v52, %v265_v50  ;;  %v276_v57 = vsub.f32 0.0, %v275_v53  ;;  %v355_v58 = vpop.f32.mrb[7].mxu0 }
 0x2dd   :  { %v272_v60 = vrot.slane %v270_v56, 5  ;;  %v277_v61 = vmul.f32 1.442695, %v276_v57 }
 0x2df   :  { %373 = vpow2.f32 %v277_v61  ;;  %v274_v62 = vsub.f32 %v266_v59, %v272_v60 }
 0x2e9   :  { %v374_v63 = vpop.eup %373 }
 0x2ea   :  { %v279_v0 = vadd.f32 1.0, %v374_v63 }
 0x2ec   :  { %375 = vlog2.f32 %v279_v0 }
 0x2f6   :  { %v376_v3 = vpop.eup %375 }
 0x2f7   :  { %v281_v4 = vmul.f32 0.6931472, %v376_v3 }
 0x2f9   :  { %v282_v5 = vadd.f32 %v281_v4, %v274_v62 }
 0x2fb   :  { %v286_v6 = vsel %vm285_vm5, %v282_v5, 0.0 }
 0x2fc   :  { %v288_v7 = vsel %vm287_vm6, %v286_v6, 0.0 }
 0x2fd   :  { %289 = vadd.xlane.f32.xlu0 %v288_v7 }
 0x38a   :  { %v290_v8 = vpop.xlane.xlu0 %289 }
 0x38b   :  { %v291_v9 = vmul.f32 0.02, %v290_v8 }
 0x38d   :  { %293 = vst.msk [vmem:[#allocation6] sm:$0x1] %vm292_vm7, %v291_v9 }
 0x38e   :  { %410 = shalt.err (!%p407_p12)
}
 0x38f   :  { %s411_s11 = scalar_lea.hbm %s513_s4, 16 }
 0x390   :  { %p412_p13 = scmp.ne.s32.totalorder %s513_s4, %s411_s11  ;;  %p415_p0 = scmp.lt.u32.totalorder %s411_s11, %s513_s4 }
 0x392   :  { %p417_p1 = pnand %p415_p0, %p412_p13 }
 0x394   :  { %420 = shalt.err (!%p417_p1)
}
 0x395   :  { %303 = dma.vmem_to_hbm [thread:$0]  %s301_s1, 16, %s513_s4, [#allocation5]  }
 0x396   :  { %423 = dma.done.wait [#allocation5], 16  }
 0x397   :  { %424 = vsyncadd [#allocation5], 4294967280 }
 0x398   :  { %307 = vsyncpa [#allocation4], 1 }
 0x399   :  { %308 = vsyncpa [#allocation5], 1 }

</bundles_post_ra>
